<compile_context>
chip_gen: v7x
topology: tpu7x:2x2x1
jax: 0.10.0
libtpu: 0.0.40
codegen_flags: <defaults>
</compile_context>

<pallas_src>
import jax
import jax.numpy as jnp
from jax.experimental import pallas as pl
from jax.experimental.pallas import tpu as pltpu

_LANES = 128
_SUBLANES = 8


def scale_inv_mse(pred, targ, *, max_block_rows=2048):
    """Pallas TPU port of scale_inv_MSE.forward: sum(pred - targ)**2 / numel**2."""
    assert pred.shape == targ.shape, (pred.shape, targ.shape)
    n = int(pred.size)
    denom = float(n) ** 2  # numel ** 2 (Python scalar, folded at trace time)

    # Flatten to a lane-dense (rows, 128) layout; pad rows so the block shape
    # is a multiple of (8, 128) and evenly divides the padded array.
    rows = (n + _LANES - 1) // _LANES
    block_rows = min(max_block_rows, ((rows + _SUBLANES - 1) // _SUBLANES) * _SUBLANES)
    rows_padded = ((rows + block_rows - 1) // block_rows) * block_rows
    padded_n = rows_padded * _LANES

    def _to_lane_dense(a):
        flat = a.reshape(-1)
        if padded_n != n:
            flat = jnp.pad(flat, (0, padded_n - n))  # zero padding: exact (0 - 0 = 0)
        return flat.reshape(rows_padded, _LANES)

    p2 = _to_lane_dense(pred)
    t2 = _to_lane_dense(targ)

    def kernel(p_ref, t_ref, o_ref, acc_ref):
        i = pl.program_id(0)

        @pl.when(i == 0)
        def _init():
            acc_ref[...] = jnp.zeros_like(acc_ref)

        # VPU subtract + reduce in f32 (matches PyTorch f32 accumulation).
        diff = p_ref[...].astype(jnp.float32) - t_ref[...].astype(jnp.float32)
        acc_ref[...] += jnp.sum(diff)

        @pl.when(i == pl.num_programs(0) - 1)
        def _finalize():
            s = acc_ref[...]
            o_ref[...] = (s * s) / denom

    out = pl.pallas_call(
        kernel,
        out_shape=jax.ShapeDtypeStruct((1, 1), jnp.float32),
        grid_spec=pltpu.PrefetchScalarGridSpec(
            num_scalar_prefetch=0,
            grid=(rows_padded // block_rows,),
            in_specs=[
                pl.BlockSpec((block_rows, _LANES), lambda i: (i, 0)),
                pl.BlockSpec((block_rows, _LANES), lambda i: (i, 0)),
            ],
            # Output is a resident accumulator block (same index every step).
            out_specs=pl.BlockSpec((1, 1), lambda i: (0, 0)),
            scratch_shapes=[pltpu.VMEM((1, 1), jnp.float32)],
        ),
        compiler_params=pltpu.CompilerParams(
            dimension_semantics=("arbitrary",),  # carried accumulator -> reduction axis
            vmem_limit_bytes=64 * 1024 * 1024,
        ),
    )(p2, t2)

    return out.reshape(())  # 0-d scalar, like the PyTorch module's output


if __name__ == "__main__":
    key = jax.random.PRNGKey(0)
    k1, k2 = jax.random.split(key)
    pred = jax.random.normal(k1, (2, 4, 16, 16), dtype=jnp.float32)
    targ = jax.random.normal(k2, (2, 4, 16, 16), dtype=jnp.float32)

    y = scale_inv_mse(pred, targ)
    y = jax.block_until_ready(y)

    # Pure-JAX reference of the PyTorch forward.
    diff = pred - targ
    ref = jnp.sum(diff) ** 2 / float(diff.size) ** 2

    assert y.shape == (), y.shape
    assert y.dtype == jnp.float32, y.dtype
    assert jnp.allclose(y, ref, rtol=1e-4, atol=1e-10), (float(y), float(ref))

    print("KERNEL_OK")
</pallas_src>

<mosaic_0001>
module attributes {stable_mosaic.version = 11 : i64} {
  func.func @kernel(%arg0: i32, %arg1: memref<16x128xf32, #tpu.memory_space<vmem>>, %arg2: memref<16x128xf32, #tpu.memory_space<vmem>>, %arg3: memref<1x1xf32, #tpu.memory_space<vmem>>, %arg4: memref<1x1xf32, #tpu.memory_space<vmem>>) attributes {dimension_semantics = [#tpu.dimension_semantics<arbitrary>], iteration_bounds = array<i64: 1>, scalar_prefetch = 0 : i64, scratch_operands = 1 : i64, tpu.core_type = #tpu.core_type<tc>, window_params = [{transform_indices = @transform_0, window_bounds = array<i64: 16, 128>}, {transform_indices = @transform_1, window_bounds = array<i64: 16, 128>}, {pipeline_mode = #tpu.pipeline_mode<synchronous>, transform_indices = @transform_2, window_bounds = array<i64: 1, 1>}]} {
    %c0_i32 = arith.constant 0 : i32
    %0 = arith.cmpi eq, %arg0, %c0_i32 : i32
    %1 = arith.extui %0 : i1 to i32
    %c0_i32_0 = arith.constant 0 : i32
    %2 = arith.cmpi ne, %1, %c0_i32_0 : i32
    scf.if %2 {
      %cst_10 = arith.constant 0.000000e+00 : f32
      %17 = vector.broadcast %cst_10 : f32 to vector<1x1xf32>
      %c0_11 = arith.constant 0 : index
      %c0_12 = arith.constant 0 : index
      %18 = vector.load %arg4[%c0_11, %c0_12] : memref<1x1xf32, #tpu.memory_space<vmem>>, vector<1x1xf32>
      tpu.vector_store %arg4[%c0_11, %c0_12], %17 {strides = array<i32>} : memref<1x1xf32, #tpu.memory_space<vmem>>, vector<1x1xf32>,
    } else {
    }
    %c0 = arith.constant 0 : index
    %c0_1 = arith.constant 0 : index
    %3 = vector.load %arg1[%c0, %c0_1] : memref<16x128xf32, #tpu.memory_space<vmem>>, vector<16x128xf32>
    %c0_2 = arith.constant 0 : index
    %c0_3 = arith.constant 0 : index
    %4 = vector.load %arg2[%c0_2, %c0_3] : memref<16x128xf32, #tpu.memory_space<vmem>>, vector<16x128xf32>
    %5 = arith.subf %3, %4 : vector<16x128xf32>
    %c0_4 = arith.constant 0 : index
    %c0_5 = arith.constant 0 : index
    %6 = vector.load %arg4[%c0_4, %c0_5] : memref<1x1xf32, #tpu.memory_space<vmem>>, vector<1x1xf32>
    %7 = vector.shape_cast %5 : vector<16x128xf32> to vector<1x16x128xf32>
    %cst = arith.constant dense<0.000000e+00> : vector<1xf32>
    %8 = vector.multi_reduction <add>, %7, %cst [1, 2] : vector<1x16x128xf32> to vector<1xf32>
    %9 = vector.shape_cast %8 : vector<1xf32> to vector<1x1x1xf32>
    %10 = vector.extract %9[0, 0, 0] : f32 from vector<1x1x1xf32>
    %11 = vector.broadcast %10 : f32 to vector<1x1xf32>
    %12 = arith.addf %6, %11 : vector<1x1xf32>
    %c0_6 = arith.constant 0 : index
    %c0_7 = arith.constant 0 : index
    %13 = vector.load %arg4[%c0_6, %c0_7] : memref<1x1xf32, #tpu.memory_space<vmem>>, vector<1x1xf32>
    tpu.vector_store %arg4[%c0_6, %c0_7], %12 {strides = array<i32>} : memref<1x1xf32, #tpu.memory_space<vmem>>, vector<1x1xf32>,
    %c0_i32_8 = arith.constant 0 : i32
    %14 = arith.cmpi eq, %arg0, %c0_i32_8 : i32
    %15 = arith.extui %14 : i1 to i32
    %c0_i32_9 = arith.constant 0 : i32
    %16 = arith.cmpi ne, %15, %c0_i32_9 : i32
    scf.if %16 {
      %c0_10 = arith.constant 0 : index
      %c0_11 = arith.constant 0 : index
      %17 = vector.load %arg4[%c0_10, %c0_11] : memref<1x1xf32, #tpu.memory_space<vmem>>, vector<1x1xf32>
      %18 = arith.mulf %17, %17 : vector<1x1xf32>
      %cst_12 = arith.constant 0x4A800000 : f32
      %19 = vector.broadcast %cst_12 : f32 to vector<1x1xf32>
      %20 = arith.divf %18, %19 : vector<1x1xf32>
      %c0_13 = arith.constant 0 : index
      %c0_14 = arith.constant 0 : index
      %21 = vector.load %arg3[%c0_13, %c0_14] : memref<1x1xf32, #tpu.memory_space<vmem>>, vector<1x1xf32>
      tpu.vector_store %arg3[%c0_13, %c0_14], %20 {strides = array<i32>} : memref<1x1xf32, #tpu.memory_space<vmem>>, vector<1x1xf32>,
    } else {
    }
    return
  }
  func.func @transform_0(%arg0: i32) -> (i32, i32) {
    %c0_i32 = arith.constant 0 : i32
    %c0_i32_0 = arith.constant 0 : i32
    return %arg0, %c0_i32 : i32, i32
  }
  func.func @transform_1(%arg0: i32) -> (i32, i32) {
    %c0_i32 = arith.constant 0 : i32
    %c0_i32_0 = arith.constant 0 : i32
    return %arg0, %c0_i32 : i32, i32
  }
  func.func @transform_2(%arg0: i32) -> (i32, i32) {
    %c0_i32 = arith.constant 0 : i32
    %c0_i32_0 = arith.constant 0 : i32
    %c0_i32_1 = arith.constant 0 : i32
    return %c0_i32, %c0_i32_0 : i32, i32
  }
}

</mosaic_0001>

<bundles_post_ra>
// kernel: tpu_custom_call.1
= control target key start
LH: loop header
LB: loop body
LE: loop exit
PB: predicated region body
PF: predicated region fallthrough
CT: control target
= control target key end

     0   :  { %7 = vsyncpa [#allocation4], 0  ;;  %s231_s0 = inlined_call_operand.hbm [shape: f32[16,128], index: 0, kind: input, shape index: {}]   ;;  %s232_s1 = inlined_call_operand.hbm [shape: f32[16,128], index: 1, kind: input, shape index: {}]   ;;  %s233_s2 = inlined_call_operand.hbm [shape: f32[1,1], index: 2, kind: output, shape index: {}]  }
   0x1   :  { %8 = vsyncpa [#allocation7], 0 }
   0x2   :  { %9 = vsyncpa [#allocation5], 0  ;;  %s171_s9 = smov [#allocation3]   ;;  %s99_s13 = scalar_lea.hbm %s231_s0, 256 }
   0x3   :  { %s15_s10 = sshll.u32 %s171_s9, 4  ;;  %p100_p0 = scmp.ne.s32.totalorder %s231_s0, %s99_s13  ;;  %s16_s10 = int_to_ptr.vmem [resolvable:$true] %s15_s10 }
   0x4   :  { %p103_p1 = scmp.lt.u32.totalorder %s99_s13, %s231_s0 }
   0x6   :  { %p105_p2 = pnand %p103_p1, %p100_p0 }
   0x8   :  { %108 = shalt.err (!%p105_p2)
}
   0x9   :  { %s109_s18 = scalar_lea.vmem %s16_s10, 256  ;;  %p114_p4 = scmp.lt.s32.totalorder %s16_s10, %s16_s10 }
   0xa   :  { %p110_p3 = scmp.ne.s32.totalorder %s16_s10, %s109_s18  ;;  %p115_p5 = scmp.lt.s32.totalorder %s109_s18, %s109_s18 }
   0xc   :  { %p116_p6 = por %p115_p5, %p114_p4 }
   0xe   :  { %p117_p7 = pnand %p116_p6, %p110_p3 }
  0x10   :  { %120 = shalt.err (!%p117_p7)
}
  0x11   :  { %s172_s19 = smov 128   ;;  %s173_s20 = smov 8  }
  0x12   :  { %21 = dma.hbm_to_vmem [thread:$0]  %s231_s0, 256, %s16_s10, [#allocation4], %s172_s19, %s172_s19, %s173_s20  }
  0x13   :  { %s174_s23 = smov [#allocation6]   ;;  %s121_s27 = scalar_lea.hbm %s232_s1, 256 }
  0x14   :  { %s27_s24 = sshll.u32 %s174_s23, 4  ;;  %p122_p8 = scmp.ne.s32.totalorder %s232_s1, %s121_s27  ;;  %s28_s24 = int_to_ptr.vmem [resolvable:$true] %s27_s24 }
  0x15   :  { %p125_p9 = scmp.lt.u32.totalorder %s121_s27, %s232_s1 }
  0x17   :  { %p127_p10 = pnand %p125_p9, %p122_p8 }
  0x19   :  { %130 = shalt.err (!%p127_p10)
}
  0x1a   :  { %s131_s4 = scalar_lea.vmem %s28_s24, 256  ;;  %p136_p12 = scmp.lt.s32.totalorder %s28_s24, %s28_s24 }
  0x1b   :  { %p132_p11 = scmp.ne.s32.totalorder %s28_s24, %s131_s4  ;;  %p137_p13 = scmp.lt.s32.totalorder %s131_s4, %s131_s4 }
  0x1d   :  { %p138_p0 = por %p137_p13, %p136_p12 }
  0x1f   :  { %p139_p1 = pnand %p138_p0, %p132_p11 }
  0x21   :  { %142 = shalt.err (!%p139_p1)
}
  0x22   :  { %33 = dma.hbm_to_vmem [thread:$0]  %s232_s1, 256, %s28_s24, [#allocation7], %s172_s19, %s172_s19, %s173_s20  }
  0x23   :  { %165 = dma.done.wait [#allocation4], 256  }
  0x24   :  { %166 = vsyncadd [#allocation4], 4294967040 }
  0x25   :  { %167 = dma.done.wait [#allocation7], 256  }
  0x26   :  { %168 = vsyncadd [#allocation7], 4294967040  ;;  %v46_v0 = vld [vmem:[#allocation3] sm:$0xff]  ;;  %v47_v1 = vld [vmem:[#allocation3 + $0x8] sm:$0xff]  ;;  %vm44_vm0 = vcmask 0   ;;  %v175_v7 = vmov 0.0  }
  0x27   :  { %v48_v2 = vld [vmem:[#allocation6] sm:$0xff]  ;;  %v49_v3 = vld [vmem:[#allocation6 + $0x8] sm:$0xff]  ;;  %45 = vst.msk [vmem:[#allocation2] sm:$0x1] %vm44_vm0, %v175_v7  ;;  %s176_s6 = smov [#allocation8]  }
  0x28   :  { %v50_v4 = vsub.f32 %v46_v0, %v48_v2  ;;  %v51_v5 = vsub.f32 %v47_v1, %v49_v3  ;;  %s81_s7 = sshll.u32 %s176_s6, 4  ;;  %s82_s7 = int_to_ptr.vmem [resolvable:$true] %s81_s7 }
  0x29   :  { %s143_s8 = scalar_lea.vmem %s82_s7, 16  ;;  %s147_s9 = scalar_lea.vmem %s82_s7, 32 }
  0x2a   :  { %v53_v6 = vadd.f32 %v51_v5, %v50_v4  ;;  %p144_p2 = scmp.ne.s32.totalorder %s82_s7, %s143_s8  ;;  %p148_p3 = scmp.lt.s32.totalorder %s82_s7, %s82_s7 }
  0x2b   :  { %p149_p4 = scmp.lt.s32.totalorder %s147_s9, %s143_s8 }
  0x2c   :  { %54 = vadd.xlane.f32.xlu0 %v53_v6 }
  0x2d   :  { %p150_p5 = por %p149_p4, %p148_p3 }
  0x2e   :  { %v52_v15 = vld [vmem:[#allocation2] sm:$0x1] }
  0x2f   :  { %p151_p6 = pnand %p150_p5, %p144_p2 }
  0xb9   :  { %v55_v8 = vpop.xlane.xlu0 %54 }
  0xba   :  { %v56_v9 = vrot.slane %v55_v8, 4 }
  0xbc   :  { %v57_v10 = vadd.f32 %v56_v9, %v55_v8 }
  0xbe   :  { %v58_v11 = vrot.slane %v57_v10, 2 }
  0xc0   :  { %v59_v12 = vadd.f32 %v58_v11, %v57_v10 }
  0xc2   :  { %v60_v13 = vrot.slane %v59_v12, 1 }
  0xc4   :  { %v61_v14 = vadd.f32 %v60_v13, %v59_v12 }
  0xc6   :  { %91 = vpush %v61_v14 }
  0xf7   :  { %s92_s1 = spop %91 }
  0xf8   :  { %v63_v16 = vstv %s92_s1 }
  0xf9   :  { %v64_v17 = vadd.f32 %v63_v16, %v52_v15 }
  0xfb   :  { %66 = vst.msk [vmem:[#allocation2] sm:$0x1] %vm44_vm0, %v64_v17 }
 0x102   :  { %v70_v18 = vld [vmem:[#allocation2] sm:$0x1] }
 0x103   :  { %v71_v19 = vmul.f32 %v70_v18, %v70_v18 }
 0x105   :  { %v73_v20 = vmul.f32 2.3841858e-07, %v71_v19 }
 0x107   :  { %74 = vst.msk [vmem:[#allocation8] sm:$0x1] %vm44_vm0, %v73_v20 }
 0x108   :  { %154 = shalt.err (!%p151_p6)
}
 0x109   :  { %s155_s12 = scalar_lea.hbm %s233_s2, 16 }
 0x10a   :  { %p156_p7 = scmp.ne.s32.totalorder %s233_s2, %s155_s12  ;;  %p159_p8 = scmp.lt.u32.totalorder %s155_s12, %s233_s2 }
 0x10c   :  { %p161_p9 = pnand %p159_p8, %p156_p7 }
 0x10e   :  { %164 = shalt.err (!%p161_p9)
}
 0x10f   :  { %84 = dma.vmem_to_hbm [thread:$0]  %s82_s7, 16, %s233_s2, [#allocation5]  }
 0x110   :  { %169 = dma.done.wait [#allocation5], 16  }
 0x111   :  { %170 = vsyncadd [#allocation5], 4294967280 }
 0x112   :  { %88 = vsyncpa [#allocation4], 1 }
 0x113   :  { %89 = vsyncpa [#allocation7], 1 }
 0x114   :  { %90 = vsyncpa [#allocation5], 1 }

</bundles_post_ra>
